<compile_context>
chip_gen: v5e
topology: v5e:2x2
jax: 0.10.0
libtpu: 0.0.40
codegen_flags: <defaults>
</compile_context>

<pallas_src>
import functools

import jax
import jax.numpy as jnp
from jax.experimental import pallas as pl
from jax.experimental.pallas import tpu as pltpu

LANE = 128
SUBLANE_BF16 = 16  # bf16 packs 16 rows per vreg sublane group


def mlp_kernel(x_ref, w1_ref, b1_ref, w2_ref, b2_ref, wh_ref, bh_ref,
               out_ref, *, n_out):
    # Cast x to bf16 in-kernel (free on the VPU under the MXU slot).
    x = x_ref[...].astype(jnp.bfloat16)

    # fc1 + relu  (bf16 operands -> MXU, f32 accumulate / elementwise)
    h1 = jnp.dot(x, w1_ref[...], preferred_element_type=jnp.float32) + b1_ref[...]
    h1 = jnp.maximum(h1, 0.0)

    # fc2 + relu
    h2 = jnp.dot(h1.astype(jnp.bfloat16), w2_ref[...],
                 preferred_element_type=jnp.float32) + b2_ref[...]
    h2 = jnp.maximum(h2, 0.0)

    # Fused head: columns [0:n_out]=fc3_s, [n_out:2*n_out]=fc3_t, rest zero-pad.
    y = jnp.dot(h2.astype(jnp.bfloat16), wh_ref[...],
                preferred_element_type=jnp.float32) + bh_ref[...]

    # tanh only on the fc3_s columns; single lane-dense store.
    col = jax.lax.broadcasted_iota(jnp.int32, y.shape, 1)
    out_ref[...] = jnp.where(col < n_out, jnp.tanh(y), y).astype(out_ref.dtype)


def _round_up(x, m):
    return ((x + m - 1) // m) * m


def _vmem_capacity_bytes():
    try:
        return int(pltpu.get_tpu_info().vmem_capacity_bytes)
    except Exception:
        return 64 << 20  # conservative fallback (v7x per-TC VMEM)


def _default_tile_b(batch, max_rows):
    """Largest multiple-of-16 divisor of `batch` that fits the VMEM row budget."""
    if batch % SUBLANE_BF16 != 0:
        return batch  # tiny / odd batch: single full-batch tile
    cap = max(SUBLANE_BF16, min(batch, (max_rows // SUBLANE_BF16) * SUBLANE_BF16))
    best = SUBLANE_BF16
    for cand in range(SUBLANE_BF16, cap + 1, SUBLANE_BF16):
        if batch % cand == 0:
            best = cand
    return best


def mlp_forward(x, params, *, tile_b=None):
    """x: (B, n_input) float32.  Returns (s, t), each (B, n_output) float32."""
    B, n_in = x.shape
    n_hidden_p = params["w1"].shape[1]         # padded (lane-dense) hidden width
    head_w = params["w_head"].shape[1]         # padded (lane-dense) head width
    n_out = params["n_out"]

    def nbytes(a):
        return a.size * a.dtype.itemsize

    weight_bytes = sum(nbytes(params[k])
                       for k in ("w1", "b1", "w2", "b2", "w_head", "b_head"))

    # Generation-aware VMEM budget (v5e/v6e: 128 MiB, v7x: 64 MiB per TC).
    capacity = _vmem_capacity_bytes()
    usable = max(16 << 20, (capacity * 3) // 4)

    # Per-batch-row VMEM cost: double-buffered x/out tiles + f32 intermediates.
    per_row = (2 * n_in * 4) + (2 * head_w * 4) + (2 * n_hidden_p + head_w) * 4
    rows_budget = max(SUBLANE_BF16,
                      (usable - weight_bytes - (2 << 20)) // max(per_row, 1))

    if tile_b is None:
        tile_b = _default_tile_b(B, rows_budget)
    assert B % tile_b == 0, "batch must be divisible by tile_b"
    assert tile_b % SUBLANE_BF16 == 0 or tile_b == B, \
        "tile_b must be a multiple of 16 (bf16 sublane packing) or the full batch"
    grid = (B // tile_b,)

    # Actual footprint: single-buffered weights + double-buffered tiles + interm.
    need = weight_bytes + tile_b * per_row
    vmem_limit = int(min(usable, max(4 << 20, (3 * need) // 2)))

    cost = pl.CostEstimate(
        flops=2 * B * (n_in * n_hidden_p + n_hidden_p * n_hidden_p
                       + n_hidden_p * head_w),
        transcendentals=B * head_w,  # tanh evaluated on all padded columns
        bytes_accessed=B * n_in * 4 + weight_bytes + B * head_w * 4,
    )

    # Whole-array VMEM residency (copied once, no double-buffering).
    resident = pl.BlockSpec(memory_space=pltpu.MemorySpace.VMEM)

    out = pl.pallas_call(
        functools.partial(mlp_kernel, n_out=n_out),
        out_shape=jax.ShapeDtypeStruct((B, head_w), jnp.float32),
        grid_spec=pltpu.PrefetchScalarGridSpec(
            num_scalar_prefetch=0,
            grid=grid,
            in_specs=[
                pl.BlockSpec((tile_b, n_in), lambda i: (i, 0)),  # x tile (f32)
                resident,                                         # w1 (bf16)
                resident,                                         # b1 (f32)
                resident,                                         # w2 (bf16)
                resident,                                         # b2 (f32)
                resident,                                         # fused head W (bf16)
                resident,                                         # fused head b (f32)
            ],
            out_specs=pl.BlockSpec((tile_b, head_w), lambda i: (i, 0)),
        ),
        compiler_params=pltpu.CompilerParams(
            dimension_semantics=("parallel",),
            vmem_limit_bytes=vmem_limit,
        ),
        cost_estimate=cost,
    )(x, params["w1"], params["b1"], params["w2"], params["b2"],
      params["w_head"], params["b_head"])

    s = out[:, :n_out]
    t = out[:, n_out:2 * n_out]
    return s, t


def init_params(key, n_input, n_output, n_hidden):
    """nn.Linear-style U(-1/sqrt(fan_in), 1/sqrt(fan_in)) init.

    Weights stored pre-transposed as (in, out): bf16 weights, f32 biases.
    The hidden width is zero-padded to a multiple of 128 (lane-dense h1/h2,
    full MXU contraction depth) and the two heads are fused + zero-padded to
    a lane-dense 128-wide slab.  Padding is mathematically inert (zero
    weights/biases -> zero activations -> zero contributions)."""
    ks = jax.random.split(key, 8)

    def lin(kw, kb, fan_in, fan_out):
        bound = 1.0 / jnp.sqrt(jnp.float32(fan_in))
        w = jax.random.uniform(kw, (fan_in, fan_out), jnp.float32, -bound, bound)
        b = jax.random.uniform(kb, (1, fan_out), jnp.float32, -bound, bound)
        return w, b

    w1, b1 = lin(ks[0], ks[1], n_input, n_hidden)
    w2, b2 = lin(ks[2], ks[3], n_hidden, n_hidden)
    ws, bs = lin(ks[4], ks[5], n_hidden, n_output)
    wt, bt = lin(ks[6], ks[7], n_hidden, n_output)

    n_hidden_p = max(LANE, _round_up(n_hidden, LANE))
    head_w = max(LANE, _round_up(2 * n_output, LANE))

    w1_p = jnp.zeros((n_input, n_hidden_p), jnp.float32).at[:, :n_hidden].set(w1)
    b1_p = jnp.zeros((1, n_hidden_p), jnp.float32).at[:, :n_hidden].set(b1)
    w2_p = jnp.zeros((n_hidden_p, n_hidden_p), jnp.float32) \
        .at[:n_hidden, :n_hidden].set(w2)
    b2_p = jnp.zeros((1, n_hidden_p), jnp.float32).at[:, :n_hidden].set(b2)

    w_head = jnp.zeros((n_hidden_p, head_w), jnp.float32)
    w_head = w_head.at[:n_hidden, :n_output].set(ws)
    w_head = w_head.at[:n_hidden, n_output:2 * n_output].set(wt)
    b_head = jnp.zeros((1, head_w), jnp.float32)
    b_head = b_head.at[:, :n_output].set(bs[0])
    b_head = b_head.at[:, n_output:2 * n_output].set(bt[0])

    return dict(
        w1=w1_p.astype(jnp.bfloat16), b1=b1_p,
        w2=w2_p.astype(jnp.bfloat16), b2=b2_p,
        w_head=w_head.astype(jnp.bfloat16), b_head=b_head,
        n_out=n_output,
    )


def mlp_reference(x, p):
    """Pure-JAX reference replicating the kernel's bf16-operand numerics."""
    n_out = p["n_out"]
    xb = x.astype(jnp.bfloat16).astype(jnp.float32)
    w1 = p["w1"].astype(jnp.float32)
    w2 = p["w2"].astype(jnp.float32)
    wh = p["w_head"].astype(jnp.float32)
    h1 = jnp.maximum(xb @ w1 + p["b1"], 0.0)
    h1 = h1.astype(jnp.bfloat16).astype(jnp.float32)
    h2 = jnp.maximum(h1 @ w2 + p["b2"], 0.0)
    h2 = h2.astype(jnp.bfloat16).astype(jnp.float32)
    y = h2 @ wh + p["b_head"]
    s = jnp.tanh(y[:, :n_out])
    t = y[:, n_out:2 * n_out]
    return s, t


if __name__ == "__main__":
    key = jax.random.PRNGKey(0)
    k_x, k_p = jax.random.split(key)

    batch, n_input, n_output, n_hidden = 128, 4, 2, 32
    x = jax.random.normal(k_x, (batch, n_input), jnp.float32)
    params = init_params(k_p, n_input, n_output, n_hidden)

    # Default tile_b picks the full batch here (tile_b=128, grid=(1,)),
    # amortizing per-grid-step overhead; larger batches get VMEM-bounded tiles.
    s, t = mlp_forward(x, params)
    jax.block_until_ready((s, t))

    s_ref, t_ref = mlp_reference(x, params)
    assert s.shape == (batch, n_output) and t.shape == (batch, n_output)
    assert jnp.allclose(s, s_ref, atol=5e-4, rtol=5e-4)
    assert jnp.allclose(t, t_ref, atol=5e-4, rtol=5e-4)

    print("KERNEL_OK")
</pallas_src>

<mosaic_0001>
module attributes {stable_mosaic.version = 11 : i64} {
  func.func @mlp_kernel(%arg0: i32, %arg1: memref<128x4xf32, #tpu.memory_space<vmem>>, %arg2: memref<4x128xbf16, #tpu.memory_space<vmem>>, %arg3: memref<1x128xf32, #tpu.memory_space<vmem>>, %arg4: memref<128x128xbf16, #tpu.memory_space<vmem>>, %arg5: memref<1x128xf32, #tpu.memory_space<vmem>>, %arg6: memref<128x128xbf16, #tpu.memory_space<vmem>>, %arg7: memref<1x128xf32, #tpu.memory_space<vmem>>, %arg8: memref<128x128xf32, #tpu.memory_space<vmem>>) attributes {dimension_semantics = [#tpu.dimension_semantics<parallel>], iteration_bounds = array<i64: 1>, scalar_prefetch = 0 : i64, scratch_operands = 0 : i64, tpu.core_type = #tpu.core_type<tc>, window_params = [{transform_indices = @transform_0, window_bounds = array<i64: 128, 4>}, {pipeline_mode = #tpu.pipeline_mode<synchronous>, transform_indices = @transform_1, window_bounds = array<i64: 4, 128>}, {pipeline_mode = #tpu.pipeline_mode<synchronous>, transform_indices = @transform_2, window_bounds = array<i64: 1, 128>}, {pipeline_mode = #tpu.pipeline_mode<synchronous>, transform_indices = @transform_3, window_bounds = array<i64: 128, 128>}, {pipeline_mode = #tpu.pipeline_mode<synchronous>, transform_indices = @transform_4, window_bounds = array<i64: 1, 128>}, {pipeline_mode = #tpu.pipeline_mode<synchronous>, transform_indices = @transform_5, window_bounds = array<i64: 128, 128>}, {pipeline_mode = #tpu.pipeline_mode<synchronous>, transform_indices = @transform_6, window_bounds = array<i64: 1, 128>}, {transform_indices = @transform_7, window_bounds = array<i64: 128, 128>}]} {
    %c0 = arith.constant 0 : index
    %c0_0 = arith.constant 0 : index
    %0 = vector.load %arg1[%c0, %c0_0] : memref<128x4xf32, #tpu.memory_space<vmem>>, vector<128x4xf32>
    %1 = arith.truncf %0 : vector<128x4xf32> to vector<128x4xbf16>
    %c0_1 = arith.constant 0 : index
    %c0_2 = arith.constant 0 : index
    %2 = vector.load %arg2[%c0_1, %c0_2] : memref<4x128xbf16, #tpu.memory_space<vmem>>, vector<4x128xbf16>
    %cst = arith.constant dense<0.000000e+00> : vector<128x128xf32>
    %3 = tpu.matmul %1, %2, %cst {dimension_numbers = #tpu.dot_dimension_numbers<[1], [0], [0], [1], [0, 0, 1, 1], [], []>} : vector<128x4xbf16>, vector<4x128xbf16>, vector<128x128xf32> -> vector<128x128xf32>
    %c0_3 = arith.constant 0 : index
    %c0_4 = arith.constant 0 : index
    %4 = vector.load %arg3[%c0_3, %c0_4] : memref<1x128xf32, #tpu.memory_space<vmem>>, vector<1x128xf32>
    %5 = vector.broadcast %4 : vector<1x128xf32> to vector<128x128xf32>
    %6 = arith.addf %3, %5 : vector<128x128xf32>
    %cst_5 = arith.constant 0.000000e+00 : f32
    %7 = vector.broadcast %cst_5 : f32 to vector<128x128xf32>
    %8 = arith.maximumf %6, %7 : vector<128x128xf32>
    %9 = arith.truncf %8 : vector<128x128xf32> to vector<128x128xbf16>
    %c0_6 = arith.constant 0 : index
    %c0_7 = arith.constant 0 : index
    %10 = vector.load %arg4[%c0_6, %c0_7] : memref<128x128xbf16, #tpu.memory_space<vmem>>, vector<128x128xbf16>
    %cst_8 = arith.constant dense<0.000000e+00> : vector<128x128xf32>
    %11 = tpu.matmul %9, %10, %cst_8 {dimension_numbers = #tpu.dot_dimension_numbers<[1], [0], [0], [1], [0, 0, 1, 1], [], []>} : vector<128x128xbf16>, vector<128x128xbf16>, vector<128x128xf32> -> vector<128x128xf32>
    %c0_9 = arith.constant 0 : index
    %c0_10 = arith.constant 0 : index
    %12 = vector.load %arg5[%c0_9, %c0_10] : memref<1x128xf32, #tpu.memory_space<vmem>>, vector<1x128xf32>
    %13 = vector.broadcast %12 : vector<1x128xf32> to vector<128x128xf32>
    %14 = arith.addf %11, %13 : vector<128x128xf32>
    %cst_11 = arith.constant 0.000000e+00 : f32
    %15 = vector.broadcast %cst_11 : f32 to vector<128x128xf32>
    %16 = arith.maximumf %14, %15 : vector<128x128xf32>
    %17 = arith.truncf %16 : vector<128x128xf32> to vector<128x128xbf16>
    %c0_12 = arith.constant 0 : index
    %c0_13 = arith.constant 0 : index
    %18 = vector.load %arg6[%c0_12, %c0_13] : memref<128x128xbf16, #tpu.memory_space<vmem>>, vector<128x128xbf16>
    %cst_14 = arith.constant dense<0.000000e+00> : vector<128x128xf32>
    %19 = tpu.matmul %17, %18, %cst_14 {dimension_numbers = #tpu.dot_dimension_numbers<[1], [0], [0], [1], [0, 0, 1, 1], [], []>} : vector<128x128xbf16>, vector<128x128xbf16>, vector<128x128xf32> -> vector<128x128xf32>
    %c0_15 = arith.constant 0 : index
    %c0_16 = arith.constant 0 : index
    %20 = vector.load %arg7[%c0_15, %c0_16] : memref<1x128xf32, #tpu.memory_space<vmem>>, vector<1x128xf32>
    %21 = vector.broadcast %20 : vector<1x128xf32> to vector<128x128xf32>
    %22 = arith.addf %19, %21 : vector<128x128xf32>
    %23 = tpu.iota {dimensions = array<i32: 1>} : vector<128x128xi32>
    %c2_i32 = arith.constant 2 : i32
    %24 = vector.broadcast %c2_i32 : i32 to vector<128x128xi32>
    %25 = arith.cmpi slt, %23, %24 : vector<128x128xi32>
    %26 = math.tanh %22 : vector<128x128xf32>
    %27 = arith.select %25, %26, %22 : vector<128x128xi1>, vector<128x128xf32>
    %c0_17 = arith.constant 0 : index
    %c0_18 = arith.constant 0 : index
    %28 = vector.load %arg8[%c0_17, %c0_18] : memref<128x128xf32, #tpu.memory_space<vmem>>, vector<128x128xf32>
    tpu.vector_store %arg8[%c0_17, %c0_18], %27 {strides = array<i32>} : memref<128x128xf32, #tpu.memory_space<vmem>>, vector<128x128xf32>,
    return
  }
  func.func @transform_0(%arg0: i32) -> (i32, i32) {
    %c0_i32 = arith.constant 0 : i32
    %c0_i32_0 = arith.constant 0 : i32
    return %arg0, %c0_i32 : i32, i32
  }
  func.func @transform_1(%arg0: i32) -> (i32, i32) {
    %c0_i32 = arith.constant 0 : i32
    %c0_i32_0 = arith.constant 0 : i32
    %c0_i32_1 = arith.constant 0 : i32
    return %c0_i32, %c0_i32_0 : i32, i32
  }
  func.func @transform_2(%arg0: i32) -> (i32, i32) {
    %c0_i32 = arith.constant 0 : i32
    %c0_i32_0 = arith.constant 0 : i32
    %c0_i32_1 = arith.constant 0 : i32
    return %c0_i32, %c0_i32_0 : i32, i32
  }
  func.func @transform_3(%arg0: i32) -> (i32, i32) {
    %c0_i32 = arith.constant 0 : i32
    %c0_i32_0 = arith.constant 0 : i32
    %c0_i32_1 = arith.constant 0 : i32
    return %c0_i32, %c0_i32_0 : i32, i32
  }
  func.func @transform_4(%arg0: i32) -> (i32, i32) {
    %c0_i32 = arith.constant 0 : i32
    %c0_i32_0 = arith.constant 0 : i32
    %c0_i32_1 = arith.constant 0 : i32
    return %c0_i32, %c0_i32_0 : i32, i32
  }
  func.func @transform_5(%arg0: i32) -> (i32, i32) {
    %c0_i32 = arith.constant 0 : i32
    %c0_i32_0 = arith.constant 0 : i32
    %c0_i32_1 = arith.constant 0 : i32
    return %c0_i32, %c0_i32_0 : i32, i32
  }
  func.func @transform_6(%arg0: i32) -> (i32, i32) {
    %c0_i32 = arith.constant 0 : i32
    %c0_i32_0 = arith.constant 0 : i32
    %c0_i32_1 = arith.constant 0 : i32
    return %c0_i32, %c0_i32_0 : i32, i32
  }
  func.func @transform_7(%arg0: i32) -> (i32, i32) {
    %c0_i32 = arith.constant 0 : i32
    %c0_i32_0 = arith.constant 0 : i32
    return %arg0, %c0_i32 : i32, i32
  }
}

</mosaic_0001>

<bundles_post_ra>
// kernel: tpu_custom_call.1
= control target key start
LH: loop header
LB: loop body
LE: loop exit
PB: predicated region body
PF: predicated region fallthrough
CT: control target
= control target key end

     0   :  { %vm82_vm0 = vcmask 1041408   ;;  %vm57_vm1 = vcmask 31744   ;;  %s887_s0 = inlined_call_operand.vmem [shape: f32[128,4], index: 0, kind: input, shape index: {}]   ;;  %s888_s1 = inlined_call_operand.vmem [shape: bf16[4,128], index: 1, kind: input, shape index: {}]   ;;  %s889_s2 = inlined_call_operand.vmem [shape: f32[1,128], index: 2, kind: input, shape index: {}]   ;;  %s890_s3 = inlined_call_operand.vmem [shape: bf16[128,128], index: 3, kind: input, shape index: {}]   ;;  %s891_s4 = inlined_call_operand.vmem [shape: f32[1,128], index: 4, kind: input, shape index: {}]   ;;  %s892_s5 = inlined_call_operand.vmem [shape: bf16[128,128], index: 5, kind: input, shape index: {}]   ;;  %s893_s6 = inlined_call_operand.vmem [shape: f32[1,128], index: 6, kind: input, shape index: {}]   ;;  %s894_s7 = inlined_call_operand.hbm [shape: f32[128,128], index: 7, kind: output, shape index: {}]  }
   0x1   :  { %v52_v0 = vld [vmem:[%s888_s1] sm:$0x3]  ;;  %v29_v2 = vld [vmem:[%s887_s0 + $0x8] sm:$0xff] }
   0x2   :  { %v28_v1 = vld [vmem:[%s887_s0] sm:$0xff]  ;;  %v84_v3 = vsel %vm82_vm0, %v52_v0, 0 }
   0x3   :  { %v44_v4 = vpack.c.bf16 %v29_v2, %v28_v1  ;;  %93 = vmatpush.bf16.msra.mxu0 %v84_v3 }
   0x4   :  { %12 = vsyncpa [#allocation3], 0  ;;  %v30_v5 = vld [vmem:[%s887_s0 + $0x10] sm:$0xff]  ;;  %v31_v6 = vld [vmem:[%s887_s0 + $0x18] sm:$0xff]  ;;  %s474_s22 = sshll.u32 %s894_s7, 4  ;;  %s655_s23 = smov 128   ;;  %s475_s22 = int_to_ptr.hbm [resolvable:$true] %s474_s22 }
   0x5   :  { %v45_v7 = vpack.c.bf16 %v31_v6, %v30_v5  ;;  %v32_v8 = vld [vmem:[%s887_s0 + $0x20] sm:$0xff]  ;;  %v33_v9 = vld [vmem:[%s887_s0 + $0x28] sm:$0xff]  ;;  %v34_v11 = vld [vmem:[%s887_s0 + $0x30] sm:$0xff]  ;;  %s656_s24 = smov 8  }
   0x6   :  { %486 = vmatmul.msk.bf16.vlgmr.msra.gmra.mxu0 %vm57_vm1, %v44_v4  ;;  %v46_v10 = vpack.c.bf16 %v33_v9, %v32_v8  ;;  %v35_v12 = vld [vmem:[%s887_s0 + $0x38] sm:$0xff]  ;;  %v36_v14 = vld [vmem:[%s887_s0 + $0x40] sm:$0xff]  ;;  %v37_v15 = vld [vmem:[%s887_s0 + $0x48] sm:$0xff] }
   0x7   :  { %v47_v13 = vpack.c.bf16 %v35_v12, %v34_v11  ;;  %v48_v16 = vpack.c.bf16 %v37_v15, %v36_v14  ;;  %v565_v17 = vld [vmem:[%s890_s3 + $0x38] sm:$0xff]  ;;  %v38_v18 = vld [vmem:[%s887_s0 + $0x50] sm:$0xff]  ;;  %v563_v22 = vld [vmem:[%s890_s3 + $0x28] sm:$0xff] }
   0x8   :  { %227 = vmatpush.bf16.msra.mxu1 %v565_v17  ;;  %574 = vmatpush.bf16.msra.mxu3 %v565_v17  ;;  %v39_v19 = vld [vmem:[%s887_s0 + $0x58] sm:$0xff]  ;;  %v564_v21 = vld [vmem:[%s890_s3 + $0x30] sm:$0xff]  ;;  %v562_v23 = vld [vmem:[%s890_s3 + $0x20] sm:$0xff] }
   0x9   :  { %v49_v20 = vpack.c.bf16 %v39_v19, %v38_v18  ;;  %v40_v24 = vld [vmem:[%s887_s0 + $0x60] sm:$0xff]  ;;  %v41_v25 = vld [vmem:[%s887_s0 + $0x68] sm:$0xff]  ;;  %v561_v26 = vld [vmem:[%s890_s3 + $0x18] sm:$0xff] }
   0xa   :  { %v50_v27 = vpack.c.bf16 %v41_v25, %v40_v24  ;;  %v560_v28 = vld [vmem:[%s890_s3 + $0x10] sm:$0xff]  ;;  %v559_v29 = vld [vmem:[%s890_s3 + $0x8] sm:$0xff]  ;;  %v558_v30 = vld [vmem:[%s890_s3] sm:$0xff] }
   0xb   :  { %v42_v31 = vld [vmem:[%s887_s0 + $0x70] sm:$0xff]  ;;  %v43_v32 = vld [vmem:[%s887_s0 + $0x78] sm:$0xff]  ;;  %v783_v35 = vld [vmem:[%s889_s2] ss:$0 sm:$0xff] }
   0xc   :  { %228 = vmatpush.bf16.msra.mxu1 %v564_v21  ;;  %575 = vmatpush.bf16.msra.mxu3 %v564_v21  ;;  %v51_v33 = vpack.c.bf16 %v43_v32, %v42_v31  ;;  %v572_v14 = vld [vmem:[%s892_s5 + $0x30] sm:$0xff]  ;;  %v570_v17 = vld [vmem:[%s892_s5 + $0x20] sm:$0xff]  ;;  %v569_v21 = vld [vmem:[%s892_s5 + $0x18] sm:$0xff] }
   0xd   :  { %v568_v25 = vld [vmem:[%s892_s5 + $0x10] sm:$0xff] }
  0x10   :  { %229 = vmatpush.bf16.msra.mxu1 %v563_v22  ;;  %576 = vmatpush.bf16.msra.mxu3 %v563_v22 }
  0x14   :  { %230 = vmatpush.bf16.msra.mxu1 %v562_v23  ;;  %577 = vmatpush.bf16.msra.mxu3 %v562_v23 }
  0x16   :  { %487 = vmatmul.msk.bf16.gmra.mxu0 %vm57_vm1, %v45_v7 }
  0x18   :  { %231 = vmatpush.bf16.msra.mxu1 %v561_v26  ;;  %578 = vmatpush.bf16.msra.mxu3 %v561_v26 }
  0x1c   :  { %232 = vmatpush.bf16.msra.mxu1 %v560_v28  ;;  %579 = vmatpush.bf16.msra.mxu3 %v560_v28  ;;  %v566_v28 = vld [vmem:[%s892_s5] sm:$0xff] }
  0x20   :  { %233 = vmatpush.bf16.msra.mxu1 %v559_v29  ;;  %580 = vmatpush.bf16.msra.mxu3 %v559_v29 }
  0x24   :  { %234 = vmatpush.bf16.msra.mxu1 %v558_v30  ;;  %581 = vmatpush.bf16.msra.mxu3 %v558_v30 }
  0x26   :  { %488 = vmatmul.msk.bf16.gmra.mxu0 %vm57_vm1, %v46_v10  ;;  %v573_v10 = vld [vmem:[%s892_s5 + $0x38] sm:$0xff] }
  0x27   :  { %368 = vmatpush.bf16.msra.mxu2 %v573_v10 }
  0x28   :  { %582 = vmatpush.bf16.msrb.mxu3 %v573_v10 }
  0x2b   :  { %369 = vmatpush.bf16.msra.mxu2 %v572_v14 }
  0x2c   :  { %583 = vmatpush.bf16.msrb.mxu3 %v572_v14 }
  0x36   :  { %489 = vmatmul.msk.bf16.gmra.mxu0 %vm57_vm1, %v47_v13 }
  0x46   :  { %490 = vmatmul.msk.bf16.gmra.mxu0 %vm57_vm1, %v48_v16  ;;  %v571_v16 = vld [vmem:[%s892_s5 + $0x28] sm:$0xff] }
  0x47   :  { %370 = vmatpush.bf16.msra.mxu2 %v571_v16  ;;  %584 = vmatpush.bf16.msrb.mxu3 %v571_v16 }
  0x4b   :  { %371 = vmatpush.bf16.msra.mxu2 %v570_v17  ;;  %585 = vmatpush.bf16.msrb.mxu3 %v570_v17 }
  0x4f   :  { %372 = vmatpush.bf16.msra.mxu2 %v569_v21  ;;  %586 = vmatpush.bf16.msrb.mxu3 %v569_v21 }
  0x53   :  { %373 = vmatpush.bf16.msra.mxu2 %v568_v25  ;;  %587 = vmatpush.bf16.msrb.mxu3 %v568_v25 }
  0x56   :  { %491 = vmatmul.msk.bf16.gmra.mxu0 %vm57_vm1, %v49_v20 }
  0x66   :  { %492 = vmatmul.msk.bf16.gmra.mxu0 %vm57_vm1, %v50_v27  ;;  %v567_v27 = vld [vmem:[%s892_s5 + $0x8] sm:$0xff] }
  0x67   :  { %374 = vmatpush.bf16.msra.mxu2 %v567_v27  ;;  %588 = vmatpush.bf16.msrb.mxu3 %v567_v27 }
  0x6b   :  { %375 = vmatpush.bf16.msra.mxu2 %v566_v28  ;;  %589 = vmatpush.bf16.msrb.mxu3 %v566_v28  ;;  %v831_v28 = vld [vmem:[%s893_s6] ss:$0 sm:$0xff]  ;;  %s654_s6 = smov [#allocation2]  }
  0x6c   :  { %s472_s19 = sshll.u32 %s654_s6, 4  ;;  %s473_s19 = int_to_ptr.vmem [resolvable:$true] %s472_s19 }
  0x76   :  { %493 = vmatmul.msk.bf16.gmra.mxu0 %vm57_vm1, %v51_v33 }
  0x83   :  { %v95_v34 = vpop.f32.mrf.mxu0 }
  0x84   :  { %v96_v36 = vadd.f32 %v783_v35, %v95_v34 }
  0x86   :  { %v135_v39 = vmax.f32 %v96_v36, 0.0 }
  0x8b   :  { %v97_v37 = vpop.f32.mrf.mxu0 }
  0x8c   :  { %v98_v38 = vadd.f32 %v783_v35, %v97_v37  ;;  %v594_v37 = vld [vmem:[%s891_s4] ss:$0 sm:$0xff] }
  0x8e   :  { %v136_v40 = vmax.f32 %v98_v38, 0.0 }
  0x90   :  { %v151_v41 = vpack.c.bf16 %v136_v40, %v135_v39 }
  0x92   :  { %235 = vmatmul.bf16.vlgmr.msra.gmra.mxu1 %v151_v41 }
  0x93   :  { %v100_v42 = vpop.f32.mrf.mxu0 }
  0x94   :  { %v101_v43 = vadd.f32 %v783_v35, %v100_v42 }
  0x96   :  { %v137_v46 = vmax.f32 %v101_v43, 0.0 }
  0x9b   :  { %v102_v44 = vpop.f32.mrf.mxu0 }
  0x9c   :  { %v103_v45 = vadd.f32 %v783_v35, %v102_v44 }
  0x9e   :  { %v138_v47 = vmax.f32 %v103_v45, 0.0 }
  0xa0   :  { %v152_v48 = vpack.c.bf16 %v138_v47, %v137_v46 }
  0xa2   :  { %240 = vmatmul.bf16.gmra.mxu1 %v152_v48 }
  0xa3   :  { %v105_v49 = vpop.f32.mrf.mxu0 }
  0xa4   :  { %v106_v50 = vadd.f32 %v783_v35, %v105_v49 }
  0xa6   :  { %v139_v53 = vmax.f32 %v106_v50, 0.0 }
  0xab   :  { %v107_v51 = vpop.f32.mrf.mxu0 }
  0xac   :  { %v108_v52 = vadd.f32 %v783_v35, %v107_v51 }
  0xae   :  { %v140_v54 = vmax.f32 %v108_v52, 0.0 }
  0xb0   :  { %v153_v55 = vpack.c.bf16 %v140_v54, %v139_v53 }
  0xb2   :  { %245 = vmatmul.bf16.gmra.mxu1 %v153_v55 }
  0xb3   :  { %v110_v56 = vpop.f32.mrf.mxu0 }
  0xb4   :  { %v111_v57 = vadd.f32 %v783_v35, %v110_v56 }
  0xb6   :  { %v141_v60 = vmax.f32 %v111_v57, 0.0 }
  0xbb   :  { %v112_v58 = vpop.f32.mrf.mxu0 }
  0xbc   :  { %v113_v59 = vadd.f32 %v783_v35, %v112_v58 }
  0xbe   :  { %v142_v61 = vmax.f32 %v113_v59, 0.0 }
  0xc0   :  { %v154_v62 = vpack.c.bf16 %v142_v61, %v141_v60 }
  0xc2   :  { %250 = vmatmul.bf16.gmra.mxu1 %v154_v62 }
  0xc3   :  { %v115_v63 = vpop.f32.mrf.mxu0 }
  0xc4   :  { %v116_v0 = vadd.f32 %v783_v35, %v115_v63 }
  0xc6   :  { %v143_v3 = vmax.f32 %v116_v0, 0.0 }
  0xcb   :  { %v117_v1 = vpop.f32.mrf.mxu0 }
  0xcc   :  { %v118_v2 = vadd.f32 %v783_v35, %v117_v1 }
  0xce   :  { %v144_v4 = vmax.f32 %v118_v2, 0.0 }
  0xd0   :  { %v155_v5 = vpack.c.bf16 %v144_v4, %v143_v3 }
  0xd2   :  { %255 = vmatmul.bf16.gmra.mxu1 %v155_v5 }
  0xd3   :  { %v120_v6 = vpop.f32.mrf.mxu0 }
  0xd4   :  { %v121_v7 = vadd.f32 %v783_v35, %v120_v6 }
  0xd6   :  { %v145_v11 = vmax.f32 %v121_v7, 0.0 }
  0xdb   :  { %v122_v8 = vpop.f32.mrf.mxu0 }
  0xdc   :  { %v123_v9 = vadd.f32 %v783_v35, %v122_v8 }
  0xde   :  { %v146_v12 = vmax.f32 %v123_v9, 0.0 }
  0xe0   :  { %v156_v13 = vpack.c.bf16 %v146_v12, %v145_v11 }
  0xe2   :  { %260 = vmatmul.bf16.gmra.mxu1 %v156_v13 }
  0xe3   :  { %v125_v15 = vpop.f32.mrf.mxu0 }
  0xe4   :  { %v126_v18 = vadd.f32 %v783_v35, %v125_v15 }
  0xe6   :  { %v147_v22 = vmax.f32 %v126_v18, 0.0 }
  0xeb   :  { %v127_v19 = vpop.f32.mrf.mxu0 }
  0xec   :  { %v128_v20 = vadd.f32 %v783_v35, %v127_v19 }
  0xee   :  { %v148_v23 = vmax.f32 %v128_v20, 0.0 }
  0xf0   :  { %v157_v24 = vpack.c.bf16 %v148_v23, %v147_v22 }
  0xf2   :  { %265 = vmatmul.bf16.vlgmr.msra.gmra.mxu3 %v157_v24 }
  0xf3   :  { %v130_v26 = vpop.f32.mrf.mxu0 }
  0xf4   :  { %v131_v29 = vadd.f32 %v783_v35, %v130_v26 }
  0xf6   :  { %v149_v32 = vmax.f32 %v131_v29, 0.0  ;;  %v417_v29 = vlaneseq }
  0xfb   :  { %v132_v30 = vpop.f32.mrf.mxu0 }
  0xfc   :  { %v133_v31 = vadd.f32 %v783_v35, %v132_v30 }
  0xfe   :  { %v150_v33 = vmax.f32 %v133_v31, 0.0 }
 0x100   :  { %v158_v34 = vpack.c.bf16 %v150_v33, %v149_v32  ;;  %v834_v32 = vand.u32 127, %v417_v29 }
 0x102   :  { %270 = vmatmul.bf16.gmra.mxu3 %v158_v34  ;;  %vm419_vm2 = vcmp.lt.s32.totalorder %v834_v32, 2 }
 0x10f   :  { %v236_v36 = vpop.f32.mrf.mxu1 }
 0x110   :  { %v237_v38 = vadd.f32 %v594_v37, %v236_v36 }
 0x112   :  { %v276_v41 = vmax.f32 %v237_v38, 0.0 }
 0x117   :  { %v238_v39 = vpop.f32.mrf.mxu1 }
 0x118   :  { %v239_v40 = vadd.f32 %v594_v37, %v238_v39 }
 0x11a   :  { %v277_v42 = vmax.f32 %v239_v40, 0.0 }
 0x11c   :  { %v292_v43 = vpack.c.bf16 %v277_v42, %v276_v41 }
 0x11e   :  { %376 = vmatmul.bf16.vlgmr.msra.gmra.mxu2 %v292_v43 }
 0x11f   :  { %v241_v44 = vpop.f32.mrf.mxu1 }
 0x120   :  { %v242_v45 = vadd.f32 %v594_v37, %v241_v44 }
 0x122   :  { %v278_v47 = vmax.f32 %v242_v45, 0.0 }
 0x127   :  { %v243_v46 = vpop.f32.mrf.mxu1 }
 0x128   :  { %v244_v35 = vadd.f32 %v594_v37, %v243_v46 }
 0x12a   :  { %v279_v48 = vmax.f32 %v244_v35, 0.0 }
 0x12c   :  { %v293_v49 = vpack.c.bf16 %v279_v48, %v278_v47 }
 0x12e   :  { %381 = vmatmul.bf16.gmra.mxu2 %v293_v49 }
 0x12f   :  { %v246_v50 = vpop.f32.mrf.mxu1 }
 0x130   :  { %v247_v51 = vadd.f32 %v594_v37, %v246_v50 }
 0x132   :  { %v280_v54 = vmax.f32 %v247_v51, 0.0 }
 0x137   :  { %v248_v52 = vpop.f32.mrf.mxu1 }
 0x138   :  { %v249_v53 = vadd.f32 %v594_v37, %v248_v52 }
 0x13a   :  { %v281_v55 = vmax.f32 %v249_v53, 0.0 }
 0x13c   :  { %v294_v56 = vpack.c.bf16 %v281_v55, %v280_v54 }
 0x13e   :  { %386 = vmatmul.bf16.gmra.mxu2 %v294_v56 }
 0x13f   :  { %v251_v57 = vpop.f32.mrf.mxu1 }
 0x140   :  { %v252_v58 = vadd.f32 %v594_v37, %v251_v57 }
 0x142   :  { %v282_v61 = vmax.f32 %v252_v58, 0.0 }
 0x147   :  { %v253_v59 = vpop.f32.mrf.mxu1 }
 0x148   :  { %v254_v60 = vadd.f32 %v594_v37, %v253_v59 }
 0x14a   :  { %v283_v62 = vmax.f32 %v254_v60, 0.0 }
 0x14c   :  { %v295_v63 = vpack.c.bf16 %v283_v62, %v282_v61 }
 0x14e   :  { %391 = vmatmul.bf16.gmra.mxu2 %v295_v63 }
 0x14f   :  { %v256_v0 = vpop.f32.mrf.mxu1 }
 0x150   :  { %v257_v1 = vadd.f32 %v594_v37, %v256_v0 }
 0x152   :  { %v284_v4 = vmax.f32 %v257_v1, 0.0 }
 0x157   :  { %v258_v2 = vpop.f32.mrf.mxu1 }
 0x158   :  { %v259_v3 = vadd.f32 %v594_v37, %v258_v2 }
 0x15a   :  { %v285_v5 = vmax.f32 %v259_v3, 0.0 }
 0x15c   :  { %v296_v6 = vpack.c.bf16 %v285_v5, %v284_v4 }
 0x15e   :  { %396 = vmatmul.bf16.gmra.mxu2 %v296_v6 }
 0x15f   :  { %v261_v7 = vpop.f32.mrf.mxu1 }
 0x160   :  { %v262_v8 = vadd.f32 %v594_v37, %v261_v7 }
 0x162   :  { %v286_v11 = vmax.f32 %v262_v8, 0.0 }
 0x167   :  { %v263_v9 = vpop.f32.mrf.mxu1 }
 0x168   :  { %v264_v10 = vadd.f32 %v594_v37, %v263_v9 }
 0x16a   :  { %v287_v12 = vmax.f32 %v264_v10, 0.0 }
 0x16c   :  { %v297_v13 = vpack.c.bf16 %v287_v12, %v286_v11 }
 0x16e   :  { %401 = vmatmul.bf16.gmra.mxu2 %v297_v13 }
 0x175   :  { %v266_v14 = vpop.f32.mrf.mxu3 }
 0x176   :  { %v267_v15 = vadd.f32 %v594_v37, %v266_v14 }
 0x178   :  { %v288_v18 = vmax.f32 %v267_v15, 0.0 }
 0x17d   :  { %v268_v16 = vpop.f32.mrf.mxu3 }
 0x17e   :  { %v269_v17 = vadd.f32 %v594_v37, %v268_v16 }
 0x180   :  { %v289_v19 = vmax.f32 %v269_v17, 0.0 }
 0x182   :  { %v298_v20 = vpack.c.bf16 %v289_v19, %v288_v18 }
 0x184   :  { %406 = vmatmul.bf16.vlgmr.msrb.gmra.mxu3 %v298_v20 }
 0x185   :  { %v271_v21 = vpop.f32.mrf.mxu3 }
 0x186   :  { %v272_v22 = vadd.f32 %v594_v37, %v271_v21 }
 0x188   :  { %v290_v25 = vmax.f32 %v272_v22, 0.0 }
 0x18d   :  { %v273_v23 = vpop.f32.mrf.mxu3 }
 0x18e   :  { %v274_v24 = vadd.f32 %v594_v37, %v273_v23 }
 0x190   :  { %v291_v26 = vmax.f32 %v274_v24, 0.0 }
 0x192   :  { %v299_v27 = vpack.c.bf16 %v291_v26, %v290_v25 }
 0x194   :  { %411 = vmatmul.bf16.gmra.mxu3 %v299_v27 }
 0x1a1   :  { %v377_v30 = vpop.f32.mrf.mxu2 }
 0x1a2   :  { %v378_v31 = vadd.f32 %v831_v28, %v377_v30 }
 0x1a4   :  { %596 = vtanh.f32 %v378_v31 }
 0x1a9   :  { %v379_v33 = vpop.f32.mrf.mxu2 }
 0x1aa   :  { %v597_v34 = vpop.eup %596  ;;  %v380_v36 = vadd.f32 %v831_v28, %v379_v33 }
 0x1ab   :  { %v436_v37 = vsel %vm419_vm2, %v597_v34, %v378_v31 }
 0x1ac   :  { %452 = vst [vmem:[#allocation2] sm:$0xff] %v436_v37  ;;  %598 = vtanh.f32 %v380_v36 }
 0x1b1   :  { %v382_v38 = vpop.f32.mrf.mxu2 }
 0x1b2   :  { %v599_v39 = vpop.eup %598  ;;  %v383_v40 = vadd.f32 %v831_v28, %v382_v38 }
 0x1b3   :  { %v437_v41 = vsel %vm419_vm2, %v599_v39, %v380_v36 }
 0x1b4   :  { %453 = vst [vmem:[#allocation2 + $0x8] sm:$0xff] %v437_v41  ;;  %600 = vtanh.f32 %v383_v40 }
 0x1b9   :  { %v384_v42 = vpop.f32.mrf.mxu2 }
 0x1ba   :  { %v601_v43 = vpop.eup %600  ;;  %v385_v44 = vadd.f32 %v831_v28, %v384_v42 }
 0x1bb   :  { %v438_v45 = vsel %vm419_vm2, %v601_v43, %v383_v40 }
 0x1bc   :  { %454 = vst [vmem:[#allocation2 + $0x10] sm:$0xff] %v438_v45  ;;  %602 = vtanh.f32 %v385_v44 }
 0x1c1   :  { %v387_v46 = vpop.f32.mrf.mxu2 }
 0x1c2   :  { %v603_v35 = vpop.eup %602  ;;  %v388_v47 = vadd.f32 %v831_v28, %v387_v46 }
 0x1c3   :  { %v439_v48 = vsel %vm419_vm2, %v603_v35, %v385_v44 }
 0x1c4   :  { %455 = vst [vmem:[#allocation2 + $0x18] sm:$0xff] %v439_v48  ;;  %604 = vtanh.f32 %v388_v47 }
 0x1c9   :  { %v389_v49 = vpop.f32.mrf.mxu2 }
 0x1ca   :  { %v605_v50 = vpop.eup %604  ;;  %v390_v51 = vadd.f32 %v831_v28, %v389_v49 }
 0x1cb   :  { %v440_v52 = vsel %vm419_vm2, %v605_v50, %v388_v47 }
 0x1cc   :  { %456 = vst [vmem:[#allocation2 + $0x20] sm:$0xff] %v440_v52  ;;  %606 = vtanh.f32 %v390_v51 }
 0x1d1   :  { %v392_v53 = vpop.f32.mrf.mxu2 }
 0x1d2   :  { %v607_v54 = vpop.eup %606  ;;  %v393_v55 = vadd.f32 %v831_v28, %v392_v53 }
 0x1d3   :  { %v441_v56 = vsel %vm419_vm2, %v607_v54, %v390_v51 }
 0x1d4   :  { %457 = vst [vmem:[#allocation2 + $0x28] sm:$0xff] %v441_v56  ;;  %608 = vtanh.f32 %v393_v55 }
 0x1d9   :  { %v394_v57 = vpop.f32.mrf.mxu2 }
 0x1da   :  { %v609_v58 = vpop.eup %608  ;;  %v395_v59 = vadd.f32 %v831_v28, %v394_v57 }
 0x1db   :  { %v442_v60 = vsel %vm419_vm2, %v609_v58, %v393_v55 }
 0x1dc   :  { %458 = vst [vmem:[#allocation2 + $0x30] sm:$0xff] %v442_v60  ;;  %610 = vtanh.f32 %v395_v59 }
 0x1e1   :  { %v397_v61 = vpop.f32.mrf.mxu2 }
 0x1e2   :  { %v611_v62 = vpop.eup %610  ;;  %v398_v63 = vadd.f32 %v831_v28, %v397_v61 }
 0x1e3   :  { %v443_v0 = vsel %vm419_vm2, %v611_v62, %v395_v59 }
 0x1e4   :  { %459 = vst [vmem:[#allocation2 + $0x38] sm:$0xff] %v443_v0  ;;  %612 = vtanh.f32 %v398_v63 }
 0x1e9   :  { %v399_v1 = vpop.f32.mrf.mxu2 }
 0x1ea   :  { %v613_v2 = vpop.eup %612  ;;  %v400_v3 = vadd.f32 %v831_v28, %v399_v1 }
 0x1eb   :  { %v444_v4 = vsel %vm419_vm2, %v613_v2, %v398_v63 }
 0x1ec   :  { %460 = vst [vmem:[#allocation2 + $0x40] sm:$0xff] %v444_v4  ;;  %614 = vtanh.f32 %v400_v3 }
 0x1f1   :  { %v402_v5 = vpop.f32.mrf.mxu2 }
 0x1f2   :  { %v615_v6 = vpop.eup %614  ;;  %v403_v7 = vadd.f32 %v831_v28, %v402_v5 }
 0x1f3   :  { %v445_v8 = vsel %vm419_vm2, %v615_v6, %v400_v3 }
 0x1f4   :  { %461 = vst [vmem:[#allocation2 + $0x48] sm:$0xff] %v445_v8  ;;  %616 = vtanh.f32 %v403_v7 }
 0x1f9   :  { %v404_v9 = vpop.f32.mrf.mxu2 }
 0x1fa   :  { %v617_v10 = vpop.eup %616  ;;  %v405_v11 = vadd.f32 %v831_v28, %v404_v9 }
 0x1fb   :  { %v446_v12 = vsel %vm419_vm2, %v617_v10, %v403_v7 }
 0x1fc   :  { %462 = vst [vmem:[#allocation2 + $0x50] sm:$0xff] %v446_v12  ;;  %618 = vtanh.f32 %v405_v11 }
 0x202   :  { %v619_v13 = vpop.eup %618 }
 0x203   :  { %v447_v14 = vsel %vm419_vm2, %v619_v13, %v405_v11 }
 0x204   :  { %463 = vst [vmem:[#allocation2 + $0x58] sm:$0xff] %v447_v14 }
 0x207   :  { %v407_v15 = vpop.f32.mrf.mxu3 }
 0x208   :  { %v408_v16 = vadd.f32 %v831_v28, %v407_v15 }
 0x20a   :  { %620 = vtanh.f32 %v408_v16 }
 0x20f   :  { %v409_v17 = vpop.f32.mrf.mxu3 }
 0x210   :  { %v621_v18 = vpop.eup %620  ;;  %v410_v19 = vadd.f32 %v831_v28, %v409_v17 }
 0x211   :  { %v448_v20 = vsel %vm419_vm2, %v621_v18, %v408_v16 }
 0x212   :  { %464 = vst [vmem:[#allocation2 + $0x60] sm:$0xff] %v448_v20  ;;  %622 = vtanh.f32 %v410_v19 }
 0x217   :  { %v412_v21 = vpop.f32.mrf.mxu3 }
 0x218   :  { %v623_v22 = vpop.eup %622  ;;  %v413_v23 = vadd.f32 %v831_v28, %v412_v21 }
 0x219   :  { %v449_v24 = vsel %vm419_vm2, %v623_v22, %v410_v19 }
 0x21a   :  { %465 = vst [vmem:[#allocation2 + $0x68] sm:$0xff] %v449_v24  ;;  %624 = vtanh.f32 %v413_v23 }
 0x21f   :  { %v414_v25 = vpop.f32.mrf.mxu3 }
 0x220   :  { %v625_v26 = vpop.eup %624  ;;  %v415_v27 = vadd.f32 %v831_v28, %v414_v25 }
 0x221   :  { %v450_v29 = vsel %vm419_vm2, %v625_v26, %v413_v23 }
 0x222   :  { %466 = vst [vmem:[#allocation2 + $0x70] sm:$0xff] %v450_v29  ;;  %626 = vtanh.f32 %v415_v27 }
 0x228   :  { %v627_v30 = vpop.eup %626 }
 0x229   :  { %v451_v31 = vsel %vm419_vm2, %v627_v30, %v415_v27 }
 0x22a   :  { %467 = vst [vmem:[#allocation2 + $0x78] sm:$0xff] %v451_v31 }
 0x22b   :  { %480 = dma.vmem_to_hbm [thread:$0]  %s473_s19, 2048, %s475_s22, [#allocation3], %s655_s23, %s655_s23, %s656_s24  }
 0x22c   :  { %652 = dma.done.wait [#allocation3], 2048  }
 0x22d   :  { %653 = vsyncadd [#allocation3], 4294965248 }
 0x22e   :  { %485 = vsyncpa [#allocation3], 1 }

</bundles_post_ra>
